<compile_context>
chip_gen: v5e
topology: v5e:2x2
jax: 0.10.0
libtpu: 0.0.40
codegen_flags: <defaults>
</compile_context>

<pallas_src>
import functools

import jax
import jax.numpy as jnp
from jax.experimental import pallas as pl
from jax.experimental.pallas import tpu as pltpu

EPS = 1e-5  # PyTorch InstanceNorm2d default eps


def _double_conv_kernel(x_ref, b1_ref, b2_ref, p_ref, g1_ref, bb1_ref,
                        g2_ref, bb2_ref, o_ref, xp1_ref, xp2_ref,
                        *, H, W, Cin, Cout):
    # x_ref : (1, H, W*Cin)       lane-dense input tile for one batch element (f32)
    # b1_ref: (3, W*Cin,  W*Cout) banded (Toeplitz) stage-1 weights, bf16
    # b2_ref: (3, W*Cout, W*Cout) banded stage-2 weights, bf16
    # p_ref : (W*Cout, W*Cout)    per-channel spatial-mean operator (f32)
    # g*/bb*: (1, W*Cout)         gamma / beta pre-tiled to the lane layout (f32)
    # o_ref : (1, H, W*Cout)      lane-dense output tile (f32)
    # xp*_ref: (H+2, W*C)         row-padded scratches (dy halo only)
    WCi = W * Cin
    WCo = W * Cout

    # Re-zero only the 2 halo rows each step (interior rows are fully
    # overwritten below).  Unconditional so it is megacore-safe.
    xp1_ref[0:1, :] = jnp.zeros((1, WCi), jnp.float32)
    xp1_ref[H + 1:H + 2, :] = jnp.zeros((1, WCi), jnp.float32)
    xp2_ref[0:1, :] = jnp.zeros((1, WCo), jnp.float32)
    xp2_ref[H + 1:H + 2, :] = jnp.zeros((1, WCo), jnp.float32)

    def conv_in_relu(xp_ref, b_ref, gamma, beta):
        # Banded 3x3 conv: three lane-dense matmuls; output is already in the
        # (H, W*Cout) lane layout (128 wide here), f32 accumulation.
        acc = jnp.dot(xp_ref[0:H, :].astype(jnp.bfloat16), b_ref[0],
                      preferred_element_type=jnp.float32)
        acc += jnp.dot(xp_ref[1:H + 1, :].astype(jnp.bfloat16), b_ref[1],
                       preferred_element_type=jnp.float32)
        acc += jnp.dot(xp_ref[2:H + 2, :].astype(jnp.bfloat16), b_ref[2],
                       preferred_element_type=jnp.float32)
        # InstanceNorm (biased variance over spatial), fully lane-dense:
        # sublane-sum over H, then fold over W + broadcast back via one MXU
        # matmul against the mean operator P.
        col_sum = jnp.sum(acc, axis=0, keepdims=True)            # (1, W*Cout)
        col_sq = jnp.sum(acc * acc, axis=0, keepdims=True)       # (1, W*Cout)
        mean = jnp.dot(col_sum, p_ref[...], preferred_element_type=jnp.float32)
        ex2 = jnp.dot(col_sq, p_ref[...], preferred_element_type=jnp.float32)
        inv_std = jax.lax.rsqrt(ex2 - mean * mean + EPS)          # EUP slot
        return jnp.maximum((acc - mean) * inv_std * gamma + beta, 0.0)

    # ---------------- stage 1: conv3x3 -> InstanceNorm -> ReLU ----------------
    xp1_ref[1:H + 1, :] = x_ref[0]                                # (H, W*Cin)
    y1 = conv_in_relu(xp1_ref, b1_ref, g1_ref[...], bb1_ref[...])

    # ------------- stage 2 (fused): intermediate never leaves VMEM ------------
    xp2_ref[1:H + 1, :] = y1                                      # (H, W*Cout)
    y2 = conv_in_relu(xp2_ref, b2_ref, g2_ref[...], bb2_ref[...])

    # Lane-dense full-width store (last dim = W*Cout = 128 here).
    o_ref[0] = y2.astype(o_ref.dtype)


def double_conv_fused(x_nhwc, w1, g1, b1, w2, g2, b2):
    """Fused (conv3x3 -> InstanceNorm2d(affine) -> ReLU) x 2 in one pallas_call.

    x_nhwc: (N, H, W, Cin) f32
    w1: (3, 3, Cin, Cout) HWIO   w2: (3, 3, Cout, Cout) HWIO
    g*/b*: (Cout,) or (1, Cout)
    returns: (N, H, W, Cout) f32
    """
    N, H, W, Cin = x_nhwc.shape
    Cout = w1.shape[-1]
    WCi, WCo = W * Cin, W * Cout

    x2d = x_nhwc.reshape(N, H, WCi).astype(jnp.float32)   # lane-dense input blocks

    # Banded (block-Toeplitz) weights:
    #   B[dy, xin*Ci + ci, xout*Cout + co] = w[dy, xin - xout + 1, ci, co]
    # (zero outside the 3-wide band), so the band implements the dx taps and
    # the x-direction SAME padding in the matmul itself.
    eye_dx = jnp.stack([jnp.eye(W, k=1 - dx, dtype=jnp.float32) for dx in range(3)])

    def banded(w_hwio, ci):
        b = jnp.einsum("dab,ydio->yaibo", eye_dx, w_hwio.astype(jnp.float32))
        return b.reshape(3, W * ci, WCo).astype(jnp.bfloat16)    # bf16 MXU operands

    B1 = banded(w1, Cin)       # (3, W*Cin,  W*Cout)
    B2 = banded(w2, Cout)      # (3, W*Cout, W*Cout)

    # Per-channel spatial-mean operator in the (w, c) lane layout:
    # (col_sums @ P)[0, w*Cout + c] = mean over (h, w') of channel c.
    P = jnp.tile(jnp.eye(Cout, dtype=jnp.float32), (W, W)) / float(H * W)

    def lanes(v):  # (Cout,) / (1, Cout) -> (1, W*Cout) matching the lane layout
        return jnp.tile(jnp.reshape(v, (1, Cout)).astype(jnp.float32), (1, W))

    g1l, b1l, g2l, b2l = lanes(g1), lanes(b1), lanes(g2), lanes(b2)

    kernel = functools.partial(_double_conv_kernel, H=H, W=W, Cin=Cin, Cout=Cout)
    out = pl.pallas_call(
        kernel,
        out_shape=jax.ShapeDtypeStruct((N, H, WCo), jnp.float32),
        grid=(N,),
        in_specs=[
            pl.BlockSpec((1, H, WCi), lambda n: (n, 0, 0)),    # input image
            pl.BlockSpec((3, WCi, WCo), lambda n: (0, 0, 0)),  # stage-1 banded W
            pl.BlockSpec((3, WCo, WCo), lambda n: (0, 0, 0)),  # stage-2 banded W
            pl.BlockSpec((WCo, WCo), lambda n: (0, 0)),        # IN mean operator
            pl.BlockSpec((1, WCo), lambda n: (0, 0)),          # gamma1 (lane-tiled)
            pl.BlockSpec((1, WCo), lambda n: (0, 0)),          # beta1
            pl.BlockSpec((1, WCo), lambda n: (0, 0)),          # gamma2
            pl.BlockSpec((1, WCo), lambda n: (0, 0)),          # beta2
        ],
        out_specs=pl.BlockSpec((1, H, WCo), lambda n: (n, 0, 0)),
        scratch_shapes=[
            pltpu.VMEM((H + 2, WCi), jnp.float32),   # row-padded stage-1 input
            pltpu.VMEM((H + 2, WCo), jnp.float32),   # row-padded stage-2 input
        ],
        compiler_params=pltpu.CompilerParams(
            # batch axis -> both TensorCores on v7x; no vmem_limit override
            # (default scoped limit is ample; 64 MiB == full physical VMEM on v7x).
            dimension_semantics=("parallel",),
        ),
    )(x2d, B1, B2, P, g1l, b1l, g2l, b2l)

    return out.reshape(N, H, W, Cout)


@jax.jit
def inconv_forward(x_nchw, params):
    """inconv.forward: NCHW in -> NCHW out (double conv block)."""
    x = jnp.transpose(x_nchw, (0, 2, 3, 1)).astype(jnp.float32)  # -> NHWC
    y = double_conv_fused(x, params["w1"], params["g1"], params["b1"],
                          params["w2"], params["g2"], params["b2"])
    return jnp.transpose(y, (0, 3, 1, 2))                        # -> NCHW


# ---------------- pure-JAX reference (for correctness check) ----------------
def _ref_block(x_nhwc, w_hwio, gamma, beta):
    # Same math as one (conv -> InstanceNorm(affine) -> ReLU) stage, applying
    # the same bf16 MXU-operand quantization the kernel uses (f32 accumulate).
    y = jax.lax.conv_general_dilated(
        x_nhwc.astype(jnp.bfloat16), w_hwio.astype(jnp.bfloat16),
        window_strides=(1, 1), padding="SAME",
        dimension_numbers=("NHWC", "HWIO", "NHWC"),
        preferred_element_type=jnp.float32,
    )
    mean = jnp.mean(y, axis=(1, 2), keepdims=True)
    var = jnp.mean((y - mean) ** 2, axis=(1, 2), keepdims=True)
    y = (y - mean) * jax.lax.rsqrt(var + EPS)
    y = y * gamma.reshape(1, 1, 1, -1) + beta.reshape(1, 1, 1, -1)
    return jnp.maximum(y, 0.0)


if __name__ == "__main__":
    N, in_ch, out_ch, H, W = 2, 4, 8, 16, 16

    key = jax.random.PRNGKey(0)
    ks = jax.random.split(key, 7)
    x = jax.random.normal(ks[0], (N, in_ch, H, W), jnp.float32)

    # Deterministic synthetic parameters.  Conv weights stored HWIO
    # (dy, dx, Cin, Cout); a PyTorch (Cout, Cin, 3, 3) weight maps via
    # permute(2, 3, 1, 0).
    params = {
        "w1": 0.2 * jax.random.normal(ks[1], (3, 3, in_ch, out_ch), jnp.float32),
        "g1": 1.0 + 0.1 * jax.random.normal(ks[2], (1, out_ch), jnp.float32),
        "b1": 0.1 * jax.random.normal(ks[3], (1, out_ch), jnp.float32),
        "w2": 0.2 * jax.random.normal(ks[4], (3, 3, out_ch, out_ch), jnp.float32),
        "g2": 1.0 + 0.1 * jax.random.normal(ks[5], (1, out_ch), jnp.float32),
        "b2": 0.1 * jax.random.normal(ks[6], (1, out_ch), jnp.float32),
    }

    out = jax.block_until_ready(inconv_forward(x, params))

    # Validate against a pure-JAX reference of the same double_conv math
    # (tolerance accounts for bf16 MXU operands with f32 accumulation).
    xh = jnp.transpose(x, (0, 2, 3, 1))
    ref = _ref_block(xh, params["w1"], params["g1"], params["b1"])
    ref = _ref_block(ref, params["w2"], params["g2"], params["b2"])
    ref = jnp.transpose(ref, (0, 3, 1, 2))
    max_err = float(jnp.max(jnp.abs(out - ref)))
    assert out.shape == (N, out_ch, H, W)
    assert max_err < 3e-2, f"mismatch vs reference, max abs err = {max_err}"

    print("KERNEL_OK")
</pallas_src>

<mosaic_0001>
module attributes {stable_mosaic.version = 11 : i64} {
  func.func @_double_conv_kernel(%arg0: i32, %arg1: memref<1x16x64xf32, #tpu.memory_space<vmem>>, %arg2: memref<3x64x128xbf16, #tpu.memory_space<vmem>>, %arg3: memref<3x128x128xbf16, #tpu.memory_space<vmem>>, %arg4: memref<128x128xf32, #tpu.memory_space<vmem>>, %arg5: memref<1x128xf32, #tpu.memory_space<vmem>>, %arg6: memref<1x128xf32, #tpu.memory_space<vmem>>, %arg7: memref<1x128xf32, #tpu.memory_space<vmem>>, %arg8: memref<1x128xf32, #tpu.memory_space<vmem>>, %arg9: memref<1x16x128xf32, #tpu.memory_space<vmem>>, %arg10: memref<18x64xf32, #tpu.memory_space<vmem>>, %arg11: memref<18x128xf32, #tpu.memory_space<vmem>>) attributes {dimension_semantics = [#tpu.dimension_semantics<parallel>], iteration_bounds = array<i64: 2>, scalar_prefetch = 0 : i64, scratch_operands = 2 : i64, tpu.core_type = #tpu.core_type<tc>, window_params = [{transform_indices = @transform_0, window_bounds = array<i64: 1, 16, 64>}, {pipeline_mode = #tpu.pipeline_mode<synchronous>, transform_indices = @transform_1, window_bounds = array<i64: 3, 64, 128>}, {pipeline_mode = #tpu.pipeline_mode<synchronous>, transform_indices = @transform_2, window_bounds = array<i64: 3, 128, 128>}, {pipeline_mode = #tpu.pipeline_mode<synchronous>, transform_indices = @transform_3, window_bounds = array<i64: 128, 128>}, {pipeline_mode = #tpu.pipeline_mode<synchronous>, transform_indices = @transform_4, window_bounds = array<i64: 1, 128>}, {pipeline_mode = #tpu.pipeline_mode<synchronous>, transform_indices = @transform_5, window_bounds = array<i64: 1, 128>}, {pipeline_mode = #tpu.pipeline_mode<synchronous>, transform_indices = @transform_6, window_bounds = array<i64: 1, 128>}, {pipeline_mode = #tpu.pipeline_mode<synchronous>, transform_indices = @transform_7, window_bounds = array<i64: 1, 128>}, {transform_indices = @transform_8, window_bounds = array<i64: 1, 16, 128>}]} {
    %cst = arith.constant 0.000000e+00 : f32
    %0 = vector.broadcast %cst : f32 to vector<1x64xf32>
    %c0 = arith.constant 0 : index
    %c0_0 = arith.constant 0 : index
    %1 = vector.load %arg10[%c0, %c0_0] : memref<18x64xf32, #tpu.memory_space<vmem>>, vector<1x64xf32>
    tpu.vector_store %arg10[%c0, %c0_0], %0 {strides = array<i32>} : memref<18x64xf32, #tpu.memory_space<vmem>>, vector<1x64xf32>,
    %cst_1 = arith.constant 0.000000e+00 : f32
    %2 = vector.broadcast %cst_1 : f32 to vector<1x64xf32>
    %c17 = arith.constant 17 : index
    %c0_2 = arith.constant 0 : index
    %3 = vector.load %arg10[%c17, %c0_2] : memref<18x64xf32, #tpu.memory_space<vmem>>, vector<1x64xf32>
    tpu.vector_store %arg10[%c17, %c0_2], %2 {strides = array<i32>} : memref<18x64xf32, #tpu.memory_space<vmem>>, vector<1x64xf32>,
    %cst_3 = arith.constant 0.000000e+00 : f32
    %4 = vector.broadcast %cst_3 : f32 to vector<1x128xf32>
    %c0_4 = arith.constant 0 : index
    %c0_5 = arith.constant 0 : index
    %5 = vector.load %arg11[%c0_4, %c0_5] : memref<18x128xf32, #tpu.memory_space<vmem>>, vector<1x128xf32>
    tpu.vector_store %arg11[%c0_4, %c0_5], %4 {strides = array<i32>} : memref<18x128xf32, #tpu.memory_space<vmem>>, vector<1x128xf32>,
    %cst_6 = arith.constant 0.000000e+00 : f32
    %6 = vector.broadcast %cst_6 : f32 to vector<1x128xf32>
    %c17_7 = arith.constant 17 : index
    %c0_8 = arith.constant 0 : index
    %7 = vector.load %arg11[%c17_7, %c0_8] : memref<18x128xf32, #tpu.memory_space<vmem>>, vector<1x128xf32>
    tpu.vector_store %arg11[%c17_7, %c0_8], %6 {strides = array<i32>} : memref<18x128xf32, #tpu.memory_space<vmem>>, vector<1x128xf32>,
    %c0_9 = arith.constant 0 : index
    %c0_10 = arith.constant 0 : index
    %c0_11 = arith.constant 0 : index
    %8 = vector.load %arg1[%c0_9, %c0_10, %c0_11] : memref<1x16x64xf32, #tpu.memory_space<vmem>>, vector<1x16x64xf32>
    %9 = vector.shape_cast %8 : vector<1x16x64xf32> to vector<16x64xf32>
    %c1 = arith.constant 1 : index
    %c0_12 = arith.constant 0 : index
    %10 = vector.load %arg10[%c1, %c0_12] : memref<18x64xf32, #tpu.memory_space<vmem>>, vector<16x64xf32>
    tpu.vector_store %arg10[%c1, %c0_12], %9 {strides = array<i32>} : memref<18x64xf32, #tpu.memory_space<vmem>>, vector<16x64xf32>,
    %c0_13 = arith.constant 0 : index
    %c0_14 = arith.constant 0 : index
    %11 = vector.load %arg5[%c0_13, %c0_14] : memref<1x128xf32, #tpu.memory_space<vmem>>, vector<1x128xf32>
    %c0_15 = arith.constant 0 : index
    %c0_16 = arith.constant 0 : index
    %12 = vector.load %arg6[%c0_15, %c0_16] : memref<1x128xf32, #tpu.memory_space<vmem>>, vector<1x128xf32>
    %c0_17 = arith.constant 0 : index
    %c0_18 = arith.constant 0 : index
    %13 = vector.load %arg10[%c0_17, %c0_18] : memref<18x64xf32, #tpu.memory_space<vmem>>, vector<16x64xf32>
    %14 = arith.truncf %13 : vector<16x64xf32> to vector<16x64xbf16>
    %c0_19 = arith.constant 0 : index
    %c0_20 = arith.constant 0 : index
    %c0_21 = arith.constant 0 : index
    %15 = vector.load %arg2[%c0_19, %c0_20, %c0_21] : memref<3x64x128xbf16, #tpu.memory_space<vmem>>, vector<1x64x128xbf16>
    %16 = vector.shape_cast %15 : vector<1x64x128xbf16> to vector<64x128xbf16>
    %cst_22 = arith.constant dense<0.000000e+00> : vector<16x128xf32>
    %17 = tpu.matmul %14, %16, %cst_22 {dimension_numbers = #tpu.dot_dimension_numbers<[1], [0], [0], [1], [0, 0, 1, 1], [], []>} : vector<16x64xbf16>, vector<64x128xbf16>, vector<16x128xf32> -> vector<16x128xf32>
    %c1_23 = arith.constant 1 : index
    %c0_24 = arith.constant 0 : index
    %18 = vector.load %arg10[%c1_23, %c0_24] : memref<18x64xf32, #tpu.memory_space<vmem>>, vector<16x64xf32>
    %19 = arith.truncf %18 : vector<16x64xf32> to vector<16x64xbf16>
    %c1_25 = arith.constant 1 : index
    %c0_26 = arith.constant 0 : index
    %c0_27 = arith.constant 0 : index
    %20 = vector.load %arg2[%c1_25, %c0_26, %c0_27] : memref<3x64x128xbf16, #tpu.memory_space<vmem>>, vector<1x64x128xbf16>
    %21 = vector.shape_cast %20 : vector<1x64x128xbf16> to vector<64x128xbf16>
    %cst_28 = arith.constant dense<0.000000e+00> : vector<16x128xf32>
    %22 = tpu.matmul %19, %21, %cst_28 {dimension_numbers = #tpu.dot_dimension_numbers<[1], [0], [0], [1], [0, 0, 1, 1], [], []>} : vector<16x64xbf16>, vector<64x128xbf16>, vector<16x128xf32> -> vector<16x128xf32>
    %23 = arith.addf %17, %22 : vector<16x128xf32>
    %c2 = arith.constant 2 : index
    %c0_29 = arith.constant 0 : index
    %24 = vector.load %arg10[%c2, %c0_29] : memref<18x64xf32, #tpu.memory_space<vmem>>, vector<16x64xf32>
    %25 = arith.truncf %24 : vector<16x64xf32> to vector<16x64xbf16>
    %c2_30 = arith.constant 2 : index
    %c0_31 = arith.constant 0 : index
    %c0_32 = arith.constant 0 : index
    %26 = vector.load %arg2[%c2_30, %c0_31, %c0_32] : memref<3x64x128xbf16, #tpu.memory_space<vmem>>, vector<1x64x128xbf16>
    %27 = vector.shape_cast %26 : vector<1x64x128xbf16> to vector<64x128xbf16>
    %cst_33 = arith.constant dense<0.000000e+00> : vector<16x128xf32>
    %28 = tpu.matmul %25, %27, %cst_33 {dimension_numbers = #tpu.dot_dimension_numbers<[1], [0], [0], [1], [0, 0, 1, 1], [], []>} : vector<16x64xbf16>, vector<64x128xbf16>, vector<16x128xf32> -> vector<16x128xf32>
    %29 = arith.addf %23, %28 : vector<16x128xf32>
    %cst_34 = arith.constant dense<0.000000e+00> : vector<128xf32>
    %30 = vector.multi_reduction <add>, %29, %cst_34 [0] : vector<16x128xf32> to vector<128xf32>
    %31 = vector.shape_cast %30 : vector<128xf32> to vector<1x128xf32>
    %32 = arith.mulf %29, %29 : vector<16x128xf32>
    %cst_35 = arith.constant dense<0.000000e+00> : vector<128xf32>
    %33 = vector.multi_reduction <add>, %32, %cst_35 [0] : vector<16x128xf32> to vector<128xf32>
    %34 = vector.shape_cast %33 : vector<128xf32> to vector<1x128xf32>
    %c0_36 = arith.constant 0 : index
    %c0_37 = arith.constant 0 : index
    %35 = vector.load %arg4[%c0_36, %c0_37] : memref<128x128xf32, #tpu.memory_space<vmem>>, vector<128x128xf32>
    %cst_38 = arith.constant dense<0.000000e+00> : vector<1x128xf32>
    %36 = tpu.matmul %31, %35, %cst_38 {dimension_numbers = #tpu.dot_dimension_numbers<[1], [0], [0], [1], [0, 0, 1, 1], [], []>} : vector<1x128xf32>, vector<128x128xf32>, vector<1x128xf32> -> vector<1x128xf32>
    %c0_39 = arith.constant 0 : index
    %c0_40 = arith.constant 0 : index
    %37 = vector.load %arg4[%c0_39, %c0_40] : memref<128x128xf32, #tpu.memory_space<vmem>>, vector<128x128xf32>
    %cst_41 = arith.constant dense<0.000000e+00> : vector<1x128xf32>
    %38 = tpu.matmul %34, %37, %cst_41 {dimension_numbers = #tpu.dot_dimension_numbers<[1], [0], [0], [1], [0, 0, 1, 1], [], []>} : vector<1x128xf32>, vector<128x128xf32>, vector<1x128xf32> -> vector<1x128xf32>
    %39 = arith.mulf %36, %36 : vector<1x128xf32>
    %40 = arith.subf %38, %39 : vector<1x128xf32>
    %cst_42 = arith.constant 9.99999974E-6 : f32
    %41 = vector.broadcast %cst_42 : f32 to vector<1x128xf32>
    %42 = arith.addf %40, %41 : vector<1x128xf32>
    %43 = math.rsqrt %42 : vector<1x128xf32>
    %44 = vector.broadcast %36 : vector<1x128xf32> to vector<16x128xf32>
    %45 = arith.subf %29, %44 : vector<16x128xf32>
    %46 = vector.broadcast %43 : vector<1x128xf32> to vector<16x128xf32>
    %47 = arith.mulf %45, %46 : vector<16x128xf32>
    %48 = vector.broadcast %11 : vector<1x128xf32> to vector<16x128xf32>
    %49 = arith.mulf %47, %48 : vector<16x128xf32>
    %50 = vector.broadcast %12 : vector<1x128xf32> to vector<16x128xf32>
    %51 = arith.addf %49, %50 : vector<16x128xf32>
    %cst_43 = arith.constant 0.000000e+00 : f32
    %52 = vector.broadcast %cst_43 : f32 to vector<16x128xf32>
    %53 = arith.maximumf %51, %52 : vector<16x128xf32>
    %c1_44 = arith.constant 1 : index
    %c0_45 = arith.constant 0 : index
    %54 = vector.load %arg11[%c1_44, %c0_45] : memref<18x128xf32, #tpu.memory_space<vmem>>, vector<16x128xf32>
    tpu.vector_store %arg11[%c1_44, %c0_45], %53 {strides = array<i32>} : memref<18x128xf32, #tpu.memory_space<vmem>>, vector<16x128xf32>,
    %c0_46 = arith.constant 0 : index
    %c0_47 = arith.constant 0 : index
    %55 = vector.load %arg7[%c0_46, %c0_47] : memref<1x128xf32, #tpu.memory_space<vmem>>, vector<1x128xf32>
    %c0_48 = arith.constant 0 : index
    %c0_49 = arith.constant 0 : index
    %56 = vector.load %arg8[%c0_48, %c0_49] : memref<1x128xf32, #tpu.memory_space<vmem>>, vector<1x128xf32>
    %c0_50 = arith.constant 0 : index
    %c0_51 = arith.constant 0 : index
    %57 = vector.load %arg11[%c0_50, %c0_51] : memref<18x128xf32, #tpu.memory_space<vmem>>, vector<16x128xf32>
    %58 = arith.truncf %57 : vector<16x128xf32> to vector<16x128xbf16>
    %c0_52 = arith.constant 0 : index
    %c0_53 = arith.constant 0 : index
    %c0_54 = arith.constant 0 : index
    %59 = vector.load %arg3[%c0_52, %c0_53, %c0_54] : memref<3x128x128xbf16, #tpu.memory_space<vmem>>, vector<1x128x128xbf16>
    %60 = vector.shape_cast %59 : vector<1x128x128xbf16> to vector<128x128xbf16>
    %cst_55 = arith.constant dense<0.000000e+00> : vector<16x128xf32>
    %61 = tpu.matmul %58, %60, %cst_55 {dimension_numbers = #tpu.dot_dimension_numbers<[1], [0], [0], [1], [0, 0, 1, 1], [], []>} : vector<16x128xbf16>, vector<128x128xbf16>, vector<16x128xf32> -> vector<16x128xf32>
    %c1_56 = arith.constant 1 : index
    %c0_57 = arith.constant 0 : index
    %62 = vector.load %arg11[%c1_56, %c0_57] : memref<18x128xf32, #tpu.memory_space<vmem>>, vector<16x128xf32>
    %63 = arith.truncf %62 : vector<16x128xf32> to vector<16x128xbf16>
    %c1_58 = arith.constant 1 : index
    %c0_59 = arith.constant 0 : index
    %c0_60 = arith.constant 0 : index
    %64 = vector.load %arg3[%c1_58, %c0_59, %c0_60] : memref<3x128x128xbf16, #tpu.memory_space<vmem>>, vector<1x128x128xbf16>
    %65 = vector.shape_cast %64 : vector<1x128x128xbf16> to vector<128x128xbf16>
    %cst_61 = arith.constant dense<0.000000e+00> : vector<16x128xf32>
    %66 = tpu.matmul %63, %65, %cst_61 {dimension_numbers = #tpu.dot_dimension_numbers<[1], [0], [0], [1], [0, 0, 1, 1], [], []>} : vector<16x128xbf16>, vector<128x128xbf16>, vector<16x128xf32> -> vector<16x128xf32>
    %67 = arith.addf %61, %66 : vector<16x128xf32>
    %c2_62 = arith.constant 2 : index
    %c0_63 = arith.constant 0 : index
    %68 = vector.load %arg11[%c2_62, %c0_63] : memref<18x128xf32, #tpu.memory_space<vmem>>, vector<16x128xf32>
    %69 = arith.truncf %68 : vector<16x128xf32> to vector<16x128xbf16>
    %c2_64 = arith.constant 2 : index
    %c0_65 = arith.constant 0 : index
    %c0_66 = arith.constant 0 : index
    %70 = vector.load %arg3[%c2_64, %c0_65, %c0_66] : memref<3x128x128xbf16, #tpu.memory_space<vmem>>, vector<1x128x128xbf16>
    %71 = vector.shape_cast %70 : vector<1x128x128xbf16> to vector<128x128xbf16>
    %cst_67 = arith.constant dense<0.000000e+00> : vector<16x128xf32>
    %72 = tpu.matmul %69, %71, %cst_67 {dimension_numbers = #tpu.dot_dimension_numbers<[1], [0], [0], [1], [0, 0, 1, 1], [], []>} : vector<16x128xbf16>, vector<128x128xbf16>, vector<16x128xf32> -> vector<16x128xf32>
    %73 = arith.addf %67, %72 : vector<16x128xf32>
    %cst_68 = arith.constant dense<0.000000e+00> : vector<128xf32>
    %74 = vector.multi_reduction <add>, %73, %cst_68 [0] : vector<16x128xf32> to vector<128xf32>
    %75 = vector.shape_cast %74 : vector<128xf32> to vector<1x128xf32>
    %76 = arith.mulf %73, %73 : vector<16x128xf32>
    %cst_69 = arith.constant dense<0.000000e+00> : vector<128xf32>
    %77 = vector.multi_reduction <add>, %76, %cst_69 [0] : vector<16x128xf32> to vector<128xf32>
    %78 = vector.shape_cast %77 : vector<128xf32> to vector<1x128xf32>
    %c0_70 = arith.constant 0 : index
    %c0_71 = arith.constant 0 : index
    %79 = vector.load %arg4[%c0_70, %c0_71] : memref<128x128xf32, #tpu.memory_space<vmem>>, vector<128x128xf32>
    %cst_72 = arith.constant dense<0.000000e+00> : vector<1x128xf32>
    %80 = tpu.matmul %75, %79, %cst_72 {dimension_numbers = #tpu.dot_dimension_numbers<[1], [0], [0], [1], [0, 0, 1, 1], [], []>} : vector<1x128xf32>, vector<128x128xf32>, vector<1x128xf32> -> vector<1x128xf32>
    %c0_73 = arith.constant 0 : index
    %c0_74 = arith.constant 0 : index
    %81 = vector.load %arg4[%c0_73, %c0_74] : memref<128x128xf32, #tpu.memory_space<vmem>>, vector<128x128xf32>
    %cst_75 = arith.constant dense<0.000000e+00> : vector<1x128xf32>
    %82 = tpu.matmul %78, %81, %cst_75 {dimension_numbers = #tpu.dot_dimension_numbers<[1], [0], [0], [1], [0, 0, 1, 1], [], []>} : vector<1x128xf32>, vector<128x128xf32>, vector<1x128xf32> -> vector<1x128xf32>
    %83 = arith.mulf %80, %80 : vector<1x128xf32>
    %84 = arith.subf %82, %83 : vector<1x128xf32>
    %cst_76 = arith.constant 9.99999974E-6 : f32
    %85 = vector.broadcast %cst_76 : f32 to vector<1x128xf32>
    %86 = arith.addf %84, %85 : vector<1x128xf32>
    %87 = math.rsqrt %86 : vector<1x128xf32>
    %88 = vector.broadcast %80 : vector<1x128xf32> to vector<16x128xf32>
    %89 = arith.subf %73, %88 : vector<16x128xf32>
    %90 = vector.broadcast %87 : vector<1x128xf32> to vector<16x128xf32>
    %91 = arith.mulf %89, %90 : vector<16x128xf32>
    %92 = vector.broadcast %55 : vector<1x128xf32> to vector<16x128xf32>
    %93 = arith.mulf %91, %92 : vector<16x128xf32>
    %94 = vector.broadcast %56 : vector<1x128xf32> to vector<16x128xf32>
    %95 = arith.addf %93, %94 : vector<16x128xf32>
    %cst_77 = arith.constant 0.000000e+00 : f32
    %96 = vector.broadcast %cst_77 : f32 to vector<16x128xf32>
    %97 = arith.maximumf %95, %96 : vector<16x128xf32>
    %c0_78 = arith.constant 0 : index
    %c0_79 = arith.constant 0 : index
    %c0_80 = arith.constant 0 : index
    %98 = vector.load %arg9[%c0_78, %c0_79, %c0_80] : memref<1x16x128xf32, #tpu.memory_space<vmem>>, vector<1x16x128xf32>
    %99 = vector.shape_cast %98 : vector<1x16x128xf32> to vector<16x128xf32>
    %100 = vector.shape_cast %97 : vector<16x128xf32> to vector<1x16x128xf32>
    tpu.vector_store %arg9[%c0_78, %c0_79, %c0_80], %100 {strides = array<i32>} : memref<1x16x128xf32, #tpu.memory_space<vmem>>, vector<1x16x128xf32>,
    return
  }
  func.func @transform_0(%arg0: i32) -> (i32, i32, i32) {
    %c0_i32 = arith.constant 0 : i32
    %c0_i32_0 = arith.constant 0 : i32
    %c0_i32_1 = arith.constant 0 : i32
    return %arg0, %c0_i32, %c0_i32_0 : i32, i32, i32
  }
  func.func @transform_1(%arg0: i32) -> (i32, i32, i32) {
    %c0_i32 = arith.constant 0 : i32
    %c0_i32_0 = arith.constant 0 : i32
    %c0_i32_1 = arith.constant 0 : i32
    %c0_i32_2 = arith.constant 0 : i32
    return %c0_i32, %c0_i32_0, %c0_i32_1 : i32, i32, i32
  }
  func.func @transform_2(%arg0: i32) -> (i32, i32, i32) {
    %c0_i32 = arith.constant 0 : i32
    %c0_i32_0 = arith.constant 0 : i32
    %c0_i32_1 = arith.constant 0 : i32
    %c0_i32_2 = arith.constant 0 : i32
    return %c0_i32, %c0_i32_0, %c0_i32_1 : i32, i32, i32
  }
  func.func @transform_3(%arg0: i32) -> (i32, i32) {
    %c0_i32 = arith.constant 0 : i32
    %c0_i32_0 = arith.constant 0 : i32
    %c0_i32_1 = arith.constant 0 : i32
    return %c0_i32, %c0_i32_0 : i32, i32
  }
  func.func @transform_4(%arg0: i32) -> (i32, i32) {
    %c0_i32 = arith.constant 0 : i32
    %c0_i32_0 = arith.constant 0 : i32
    %c0_i32_1 = arith.constant 0 : i32
    return %c0_i32, %c0_i32_0 : i32, i32
  }
  func.func @transform_5(%arg0: i32) -> (i32, i32) {
    %c0_i32 = arith.constant 0 : i32
    %c0_i32_0 = arith.constant 0 : i32
    %c0_i32_1 = arith.constant 0 : i32
    return %c0_i32, %c0_i32_0 : i32, i32
  }
  func.func @transform_6(%arg0: i32) -> (i32, i32) {
    %c0_i32 = arith.constant 0 : i32
    %c0_i32_0 = arith.constant 0 : i32
    %c0_i32_1 = arith.constant 0 : i32
    return %c0_i32, %c0_i32_0 : i32, i32
  }
  func.func @transform_7(%arg0: i32) -> (i32, i32) {
    %c0_i32 = arith.constant 0 : i32
    %c0_i32_0 = arith.constant 0 : i32
    %c0_i32_1 = arith.constant 0 : i32
    return %c0_i32, %c0_i32_0 : i32, i32
  }
  func.func @transform_8(%arg0: i32) -> (i32, i32, i32) {
    %c0_i32 = arith.constant 0 : i32
    %c0_i32_0 = arith.constant 0 : i32
    %c0_i32_1 = arith.constant 0 : i32
    return %arg0, %c0_i32, %c0_i32_0 : i32, i32, i32
  }
}

</mosaic_0001>

<bundles_post_ra>
// kernel: inconv_forward.1
= control target key start
LH: loop header
LB: loop body
LE: loop exit
PB: predicated region body
PF: predicated region fallthrough
CT: control target
= control target key end

     0   :  { %s1308_s27 = smov 0   ;;  %s1613_s0 = inlined_call_operand.vmem [shape: f32[2,16,64], index: 0, kind: input, shape index: {}]   ;;  %s1614_s1 = inlined_call_operand.vmem [shape: bf16[3,64,128], index: 1, kind: input, shape index: {}]   ;;  %s1615_s2 = inlined_call_operand.vmem [shape: bf16[3,128,128], index: 2, kind: input, shape index: {}]   ;;  %s1616_s3 = inlined_call_operand.vmem [shape: f32[128,128], index: 3, kind: input, shape index: {}]   ;;  %s1617_s4 = inlined_call_operand.vmem [shape: f32[1,128], index: 4, kind: input, shape index: {}]   ;;  %s1618_s5 = inlined_call_operand.vmem [shape: f32[1,128], index: 5, kind: input, shape index: {}]   ;;  %s1619_s6 = inlined_call_operand.vmem [shape: f32[1,128], index: 6, kind: input, shape index: {}]   ;;  %s1620_s7 = inlined_call_operand.vmem [shape: f32[1,128], index: 7, kind: input, shape index: {}]   ;;  %s1621_s8 = inlined_call_operand.vmem [shape: f32[2,16,128], index: 8, kind: output, shape index: {}]  }
   0x1 LB: > { %s993_s28 = sadd.s32 4294967295, %s1260_s27   ;;  %p997_p0 = scmp.ge.s32.totalorder %s1260_s27, 1  ;;  %s1260_s27 = sphi %s1308_s27, %s18_s27  }
   0x2   : > { %p262_p1 = scmp.lt.s32.totalorder %s1260_s27, 3 }
   0x4   : > { %p263_p2 = pnand %p997_p0, %p262_p1 }
   0x5   : > { %p296_p3 = scmp.lt.s32.totalorder (!%p263_p2), %s993_s28, 1 }
   0x6   : > { %266 = sbr.rel (%p263_p2) target bundleno = 696 (0x2b8), region = 52 }
   0xb   : > { %v1208_v0 = vld [vmem:[%s1614_s1 + $0x38] sm:$0xff]  ;;  %vm307_vm0 = vcmask 516096   ;;  %v1207_v2 = vld [vmem:[%s1614_s1 + $0x30] sm:$0xff]  ;;  %s1623_s28 = smov (!%p296_p3, %s993_s28), 1  ;;  %v1262_v4 = vmov 0.0   ;;  %vm314_vm1 = vcmask 523264  }
   0xc   : > { %v1204_v1 = vld [vmem:[%s1614_s1 + $0x18] sm:$0xff]  ;;  %373 = vmatpush.bf16.msra.mxu2 %v1208_v0  ;;  %v1203_v3 = vld [vmem:[%s1614_s1 + $0x10] sm:$0xff]  ;;  %308 = vst.msk [vmem:[#allocation2] sm:$0x1] %vm307_vm0, %v1262_v4  ;;  %v1206_v5 = vld [vmem:[%s1614_s1 + $0x28] sm:$0xff]  ;;  %s1199_s19 = sshll.u32 %s1623_s28, 4 }
   0xd   : > { %414 = vmatpush.bf16.msra.mxu1 %v1204_v1  ;;  %309 = vst.msk [vmem:[#allocation2 + $0x11] sm:$0x1] %vm307_vm0, %v1262_v4  ;;  %v1202_v6 = vld [vmem:[%s1614_s1 + $0x8] sm:$0xff]  ;;  %s300_s22 = scalar_lea.vmem %s1613_s0, %s1199_s19  ;;  %v1205_v9 = vld [vmem:[%s1614_s1 + $0x20] sm:$0xff]  ;;  %v1212_v11 = vld [vmem:[%s1614_s1 + $0x58] sm:$0xff]  ;;  %s305_s10 = scalar_lea.vmem %s1621_s8, %s1199_s19 }
   0xe   : > { %310 = vst [vmem:[#allocation3] sm:$0x1] %v1262_v4  ;;  %v312_v7 = vld [vmem:[%s300_s22] sm:$0xff]  ;;  %v313_v8 = vld [vmem:[%s300_s22 + $0x8] sm:$0xff]  ;;  %v1211_v15 = vld [vmem:[%s1614_s1 + $0x50] sm:$0xff] }
   0xf   : > { %311 = vst [vmem:[#allocation3 + $0x11] sm:$0x1] %v1262_v4  ;;  %v1201_v10 = vld [vmem:[%s1614_s1] sm:$0xff]  ;;  %v1210_v19 = vld [vmem:[%s1614_s1 + $0x48] sm:$0xff]  ;;  %v1368_v24 = vld [vmem:[%s1616_s3 + $0x78] sm:$0xff] }
  0x10   : > { %374 = vmatpush.bf16.msra.mxu2 %v1207_v2  ;;  %315 = vst.msk [vmem:[#allocation2 + $0x1] sm:$0xff] %vm314_vm1, %v312_v7  ;;  %v1209_v20 = vld [vmem:[%s1614_s1 + $0x40] sm:$0xff]  ;;  %v1373_v25 = vld [vmem:[%s1616_s3 + $0x70] sm:$0xff]  ;;  %511 = vmatpush.msra.mxu3 %v1368_v24  ;;  %v1380_v26 = vld [vmem:[%s1616_s3 + $0x68] sm:$0xff] }
  0x11   : > { %415 = vmatpush.bf16.msra.mxu1 %v1203_v3  ;;  %316 = vst.msk [vmem:[#allocation2 + $0x9] sm:$0xff] %vm314_vm1, %v313_v8  ;;  %531 = vmatpush.msra.mxu0 %v1368_v24  ;;  %v1389_v27 = vld [vmem:[%s1616_s3 + $0x60] sm:$0xff]  ;;  %v1396_v28 = vld [vmem:[%s1616_s3 + $0x58] sm:$0xff]  ;;  %v1403_v29 = vld [vmem:[%s1616_s3 + $0x50] sm:$0xff] }
  0x12   : > { %512 = vmatpush.msra.mxu3 %v1373_v25  ;;  %v1408_v30 = vld [vmem:[%s1616_s3 + $0x48] sm:$0xff]  ;;  %v1417_v31 = vld [vmem:[%s1616_s3 + $0x40] sm:$0xff]  ;;  %v1424_v32 = vld [vmem:[%s1616_s3 + $0x38] sm:$0xff] }
  0x13   : > { %532 = vmatpush.msra.mxu0 %v1373_v25  ;;  %v1431_v33 = vld [vmem:[%s1616_s3 + $0x30] sm:$0xff]  ;;  %v1438_v34 = vld [vmem:[%s1616_s3 + $0x28] sm:$0xff]  ;;  %v1443_v35 = vld [vmem:[%s1616_s3 + $0x20] sm:$0xff] }
  0x14   : > { %375 = vmatpush.bf16.msra.mxu2 %v1206_v5  ;;  %513 = vmatpush.msra.mxu3 %v1380_v26  ;;  %v1450_v36 = vld [vmem:[%s1616_s3 + $0x18] sm:$0xff]  ;;  %v1457_v38 = vld [vmem:[%s1616_s3 + $0x10] sm:$0xff]  ;;  %v1464_v39 = vld [vmem:[%s1616_s3 + $0x8] sm:$0xff] }
  0x15   : > { %416 = vmatpush.bf16.msra.mxu1 %v1202_v6  ;;  %533 = vmatpush.msra.mxu0 %v1380_v26  ;;  %v1471_v40 = vld [vmem:[%s1616_s3] sm:$0xff]  ;;  %v1228_v2 = vld [vmem:[%s1615_s2 + $0x78] sm:$0xff]  ;;  %v1227_v3 = vld [vmem:[%s1615_s2 + $0x70] sm:$0xff] }
  0x16   : > { %514 = vmatpush.msra.mxu3 %v1389_v27  ;;  %v1220_v4 = vld [vmem:[%s1615_s2 + $0x38] sm:$0xff]  ;;  %v1226_v6 = vld [vmem:[%s1615_s2 + $0x68] sm:$0xff]  ;;  %v1219_v7 = vld [vmem:[%s1615_s2 + $0x30] sm:$0xff] }
  0x17   : > { %v330_v12 = vld [vmem:[#allocation2 + $0x1] sm:$0xff]  ;;  %534 = vmatpush.msra.mxu0 %v1389_v27  ;;  %v1236_v5 = vld [vmem:[%s1615_s2 + $0xb8] sm:$0xff]  ;;  %v1235_v8 = vld [vmem:[%s1615_s2 + $0xb0] sm:$0xff] }
  0x18   : > { %376 = vmatpush.bf16.msra.mxu2 %v1205_v9  ;;  %v319_v13 = vld [vmem:[#allocation2] sm:$0xff]  ;;  %v331_v14 = vld [vmem:[#allocation2 + $0x9] sm:$0xff]  ;;  %515 = vmatpush.msra.mxu3 %v1396_v28 }
  0x19   : > { %417 = vmatpush.bf16.msra.mxu1 %v1201_v10  ;;  %v320_v16 = vld [vmem:[#allocation2 + $0x8] sm:$0xff]  ;;  %v332_v17 = vpack.c.bf16 %v331_v14, %v330_v12  ;;  %535 = vmatpush.msra.mxu0 %v1396_v28  ;;  %v1225_v9 = vld [vmem:[%s1615_s2 + $0x60] sm:$0xff]  ;;  %v1224_v12 = vld [vmem:[%s1615_s2 + $0x58] sm:$0xff] }
  0x1a   : > { %v321_v18 = vpack.c.bf16 %v320_v16, %v319_v13  ;;  %v424_v21 = vld [vmem:[#allocation2 + $0x2] sm:$0xff]  ;;  %v425_v22 = vld [vmem:[#allocation2 + $0xa] sm:$0xff]  ;;  %516 = vmatpush.msra.mxu3 %v1403_v29  ;;  %v1216_v16 = vld [vmem:[%s1615_s2 + $0x18] sm:$0xff] }
  0x1b   : > { %1026 = vmatmul.msk.bf16.vlgmr.msra.gmra.mxu2 %vm314_vm1, %v332_v17  ;;  %v426_v23 = vpack.c.bf16 %v425_v22, %v424_v21  ;;  %536 = vmatpush.msra.mxu0 %v1403_v29  ;;  %v1218_v10 = vld [vmem:[%s1615_s2 + $0x28] sm:$0xff]  ;;  %v1217_v13 = vld [vmem:[%s1615_s2 + $0x20] sm:$0xff]  ;;  %v1232_v17 = vld [vmem:[%s1615_s2 + $0x98] sm:$0xff] }
  0x1c   : > { %467 = vmatpush.bf16.msrb.mxu2 %v1212_v11  ;;  %1043 = vmatmul.msk.bf16.vlgmr.msra.gmra.mxu1 %vm314_vm1, %v321_v18  ;;  %v1234_v11 = vld [vmem:[%s1615_s2 + $0xa8] sm:$0xff]  ;;  %v1233_v14 = vld [vmem:[%s1615_s2 + $0xa0] sm:$0xff]  ;;  %v1215_v21 = vld [vmem:[%s1615_s2 + $0x10] sm:$0xff] }
  0x1d   : > { %517 = vmatpush.msra.mxu3 %v1408_v30  ;;  %537 = vmatpush.msra.mxu0 %v1408_v30  ;;  %v1222_v18 = vld [vmem:[%s1615_s2 + $0x48] sm:$0xff]  ;;  %v1231_v22 = vld [vmem:[%s1615_s2 + $0x90] sm:$0xff] }
  0x1e   : > { %673 = vmatpush.bf16.msrb.mxu1 %v1228_v2 }
  0x1f   : > { %518 = vmatpush.msra.mxu3 %v1417_v31  ;;  %538 = vmatpush.msra.mxu0 %v1417_v31 }
  0x20   : > { %468 = vmatpush.bf16.msrb.mxu2 %v1211_v15  ;;  %v1223_v15 = vld [vmem:[%s1615_s2 + $0x50] sm:$0xff] }
  0x21   : > { %519 = vmatpush.msra.mxu3 %v1424_v32  ;;  %539 = vmatpush.msra.mxu0 %v1424_v32 }
  0x22   : > { %674 = vmatpush.bf16.msrb.mxu1 %v1227_v3 }
  0x23   : > { %520 = vmatpush.msra.mxu3 %v1431_v33  ;;  %540 = vmatpush.msra.mxu0 %v1431_v33 }
  0x24   : > { %469 = vmatpush.bf16.msrb.mxu2 %v1210_v19 }
  0x25   : > { %521 = vmatpush.msra.mxu3 %v1438_v34  ;;  %541 = vmatpush.msra.mxu0 %v1438_v34 }
  0x26   : > { %675 = vmatpush.bf16.msrb.mxu1 %v1226_v6 }
  0x27   : > { %522 = vmatpush.msra.mxu3 %v1443_v35  ;;  %542 = vmatpush.msra.mxu0 %v1443_v35 }
  0x28   : > { %470 = vmatpush.bf16.msrb.mxu2 %v1209_v20 }
  0x29   : > { %523 = vmatpush.msra.mxu3 %v1450_v36  ;;  %543 = vmatpush.msra.mxu0 %v1450_v36 }
  0x2a   : > { %676 = vmatpush.bf16.msrb.mxu1 %v1225_v9 }
  0x2b   : > { %1068 = vmatmul.msk.bf16.vlgmr.msrb.gmra.mxu2 %vm314_vm1, %v426_v23  ;;  %524 = vmatpush.msra.mxu3 %v1457_v38  ;;  %v1221_v23 = vld [vmem:[%s1615_s2 + $0x40] sm:$0xff] }
  0x2c   : > { %544 = vmatpush.msra.mxu0 %v1457_v38  ;;  %735 = vmatpush.bf16.msra.mxu2 %v1220_v4 }
  0x2d   : > { %525 = vmatpush.msra.mxu3 %v1464_v39 }
  0x2e   : > { %545 = vmatpush.msra.mxu0 %v1464_v39  ;;  %677 = vmatpush.bf16.msrb.mxu1 %v1224_v12 }
  0x2f   : > { %526 = vmatpush.msra.mxu3 %v1471_v40 }
  0x30   : > { %546 = vmatpush.msra.mxu0 %v1471_v40  ;;  %736 = vmatpush.bf16.msra.mxu2 %v1219_v7 }
  0x31   : > { %817 = vmatpush.bf16.msrb.mxu3 %v1236_v5 }
  0x32   : > { %865 = vmatpush.msrb.mxu0 %v1368_v24  ;;  %678 = vmatpush.bf16.msrb.mxu1 %v1223_v15 }
  0x34   : > { %866 = vmatpush.msrb.mxu0 %v1373_v25  ;;  %737 = vmatpush.bf16.msra.mxu2 %v1218_v10 }
  0x35   : > { %818 = vmatpush.bf16.msrb.mxu3 %v1235_v8 }
  0x36   : > { %867 = vmatpush.msrb.mxu0 %v1380_v26  ;;  %679 = vmatpush.bf16.msrb.mxu1 %v1222_v18 }
  0x38   : > { %868 = vmatpush.msrb.mxu0 %v1389_v27  ;;  %738 = vmatpush.bf16.msra.mxu2 %v1217_v13 }
  0x39   : > { %819 = vmatpush.bf16.msrb.mxu3 %v1234_v11 }
  0x3a   : > { %869 = vmatpush.msrb.mxu0 %v1396_v28  ;;  %680 = vmatpush.bf16.msrb.mxu1 %v1221_v23 }
  0x3c   : > { %870 = vmatpush.msrb.mxu0 %v1403_v29  ;;  %739 = vmatpush.bf16.msra.mxu2 %v1216_v16 }
  0x3d   : > { %820 = vmatpush.bf16.msrb.mxu3 %v1233_v14 }
  0x3e   : > { %871 = vmatpush.msrb.mxu0 %v1408_v30  ;;  %885 = vmatpush.msra.mxu1 %v1368_v24 }
  0x40   : > { %872 = vmatpush.msrb.mxu0 %v1417_v31  ;;  %740 = vmatpush.bf16.msra.mxu2 %v1215_v21 }
  0x41   : > { %821 = vmatpush.bf16.msrb.mxu3 %v1232_v17  ;;  %886 = vmatpush.msra.mxu1 %v1373_v25 }
  0x42   : > { %873 = vmatpush.msrb.mxu0 %v1424_v32 }
  0x43   : > { %887 = vmatpush.msra.mxu1 %v1380_v26 }
  0x44   : > { %874 = vmatpush.msrb.mxu0 %v1431_v33 }
  0x45   : > { %822 = vmatpush.bf16.msrb.mxu3 %v1231_v22  ;;  %888 = vmatpush.msra.mxu1 %v1389_v27 }
  0x46   : > { %875 = vmatpush.msrb.mxu0 %v1438_v34 }
  0x47   : > { %889 = vmatpush.msra.mxu1 %v1396_v28 }
  0x48   : > { %876 = vmatpush.msrb.mxu0 %v1443_v35 }
  0x49   : > { %890 = vmatpush.msra.mxu1 %v1403_v29 }
  0x4a   : > { %877 = vmatpush.msrb.mxu0 %v1450_v36 }
  0x4b   : > { %891 = vmatpush.msra.mxu1 %v1408_v30  ;;  %v1246_v30 = vld [vmem:[%s1617_s4] ss:$0 sm:$0xff] }
  0x4c   : > { %878 = vmatpush.msrb.mxu0 %v1457_v38 }
  0x4d   : > { %892 = vmatpush.msra.mxu1 %v1417_v31 }
  0x4e   : > { %879 = vmatpush.msrb.mxu0 %v1464_v39 }
  0x4f   : > { %893 = vmatpush.msra.mxu1 %v1424_v32  ;;  %v1247_v32 = vld [vmem:[%s1618_s5] ss:$0 sm:$0xff] }
  0x50   : > { %880 = vmatpush.msrb.mxu0 %v1471_v40 }
  0x51   : > { %894 = vmatpush.msra.mxu1 %v1431_v33 }
  0x53   : > { %895 = vmatpush.msra.mxu1 %v1438_v34 }
  0x55   : > { %896 = vmatpush.msra.mxu1 %v1443_v35 }
  0x57   : > { %897 = vmatpush.msra.mxu1 %v1450_v36 }
  0x59   : > { %898 = vmatpush.msra.mxu1 %v1457_v38 }
  0x5b   : > { %899 = vmatpush.msra.mxu1 %v1464_v39 }
  0x5d   : > { %900 = vmatpush.msra.mxu1 %v1471_v40 }
  0x99   : > { %v419_v42 = vpop.f32.mrf.mxu1 }
  0x9e   : > { %v378_v37 = vpop.f32.mrf.mxu2 }
  0x9f   : > { %v420_v45 = vadd.f32 %v419_v42, %v378_v37  ;;  %v1214_v42 = vld [vmem:[%s1615_s2 + $0x8] sm:$0xff] }
  0xa0   : > { %741 = vmatpush.bf16.msra.mxu2 %v1214_v42 }
  0xa1   : > { %v421_v44 = vpop.f32.mrf.mxu1 }
  0xa6   : > { %v380_v41 = vpop.f32.mrf.mxu2 }
  0xa7   : > { %v422_v46 = vadd.f32 %v421_v44, %v380_v41 }
  0xae   : > { %v472_v43 = vpop.f32.mrf.mxu2 }
  0xaf   : > { %v1484_v47 = vadd.f32 %v472_v43, %v420_v45  ;;  %v1230_v43 = vld [vmem:[%s1615_s2 + $0x88] sm:$0xff]  ;;  %v1213_v45 = vld [vmem:[%s1615_s2] sm:$0xff] }
  0xb0   : > { %823 = vmatpush.bf16.msrb.mxu3 %v1230_v43  ;;  %742 = vmatpush.bf16.msra.mxu2 %v1213_v45 }
  0xb1   : > { %v486_v50 = vmul.f32 %v1484_v47, %v1484_v47 }
  0xb6   : > { %v474_v48 = vpop.f32.mrf.mxu2 }
  0xb7   : > { %v1487_v49 = vadd.f32 %v474_v48, %v422_v46  ;;  %v1229_v46 = vld [vmem:[%s1615_s2 + $0x80] sm:$0xff] }
  0xb8   : > { %824 = vmatpush.bf16.msrb.mxu3 %v1229_v46 }
  0xb9   : > { %v479_v51 = vadd.f32 %v1487_v49, %v1484_v47  ;;  %v487_v52 = vmul.f32 %v1487_v49, %v1487_v49 }
  0xbb   : > { %v480_v53 = vrot.slane %v479_v51, 4  ;;  %v488_v54 = vadd.f32 %v487_v52, %v486_v50 }
  0xbd   : > { %v481_v55 = vadd.f32 %v480_v53, %v479_v51  ;;  %v489_v56 = vrot.slane %v488_v54, 4 }
  0xbf   : > { %v482_v57 = vrot.slane %v481_v55, 2  ;;  %v490_v58 = vadd.f32 %v489_v56, %v488_v54 }
  0xc1   : > { %v483_v59 = vadd.f32 %v482_v57, %v481_v55  ;;  %v491_v60 = vrot.slane %v490_v58, 2 }
  0xc3   : > { %v484_v61 = vrot.slane %v483_v59, 1  ;;  %v492_v62 = vadd.f32 %v491_v60, %v490_v58 }
  0xc5   : > { %v485_v63 = vadd.f32 %v484_v61, %v483_v59  ;;  %v493_v0 = vrot.slane %v492_v62, 1 }
  0xc7   : > { %527 = vmatmul.f32.vlgmr.msra.gmra.mxu3 %v485_v63  ;;  %v494_v1 = vadd.f32 %v493_v0, %v492_v62 }
  0xc9   : > { %547 = vmatmul.f32.vlgmr.msra.gmra.mxu0 %v494_v1 }
 0x146   : > { %v548_v37 = vpop.f32.mrf.mxu0 }
 0x14a   : > { %v528_v19 = vpop.f32.mrf.mxu3 }
 0x14b   : > { %v551_v20 = vmul.f32 %v528_v19, %v528_v19  ;;  %v564_v25 = vperm.slane %v528_v19, 0 }
 0x14d   : > { %v552_v41 = vsub.f32 %v548_v37, %v551_v20  ;;  %v565_v28 = vsub.f32 %v1484_v47, %v564_v25  ;;  %v566_v29 = vsub.f32 %v1487_v49, %v564_v25 }
 0x14f   : > { %v553_v44 = vadd.f32 1e-05, %v552_v41 }
 0x151   : > { %1250 = vrsqrt.f32 %v553_v44  ;;  %vm560_vm3 = vweird.f32 %v553_v44 }
 0x157   : > { %v1251_v24 = vpop.eup %1250 }
 0x158   : > { %v555_v48 = vmul.f32 %v1251_v24, %v553_v44  ;;  %vm561_vm2 = vweird.f32 %v1251_v24 }
 0x159   : > { %vm562_vm4 = vmor %vm560_vm3, %vm561_vm2 }
 0x15a   : > { %v556_v50 = vmul.f32 %v1251_v24, %v555_v48 }
 0x15c   : > { %v557_v51 = vmul.f32 0.5, %v556_v50 }
 0x15e   : > { %v558_v52 = vsub.f32 1.5, %v557_v51 }
 0x160   : > { %v559_v26 = vmul.f32 %v1251_v24, %v558_v52 }
 0x162   : > { %v563_v27 = vsel %vm562_vm4, %v1251_v24, %v559_v26  ;;  %v1248_v26 = vld [vmem:[%s1619_s6] ss:$0 sm:$0xff] }
 0x163   : > { %v567_v53 = vperm.slane %v563_v27, 0 }
 0x165   : > { %v568_v31 = vmul.f32 %v567_v53, %v565_v28  ;;  %v569_v54 = vmul.f32 %v567_v53, %v566_v29  ;;  %v1249_v29 = vld [vmem:[%s1620_s7] ss:$0 sm:$0xff] }
 0x167   : > { %v573_v33 = vmul.f32 %v1246_v30, %v568_v31  ;;  %v574_v55 = vmul.f32 %v1246_v30, %v569_v54 }
 0x169   : > { %v578_v47 = vadd.f32 %v1247_v32, %v573_v33  ;;  %v579_v49 = vadd.f32 %v1247_v32, %v574_v55 }
 0x16b   : > { %v580_v56 = vmax.f32 %v578_v47, 0.0  ;;  %v581_v57 = vmax.f32 %v579_v49, 0.0 }
 0x16d   : > { %582 = vst [vmem:[#allocation3 + $0x1] sm:$0xff] %v580_v56  ;;  %v607_v34 = vpack.c.bf16 %v581_v57, %v580_v56 }
 0x16e   : > { %583 = vst [vmem:[#allocation3 + $0x9] sm:$0xff] %v581_v57 }
 0x16f   : > { %681 = vmatmul.bf16.vlgmr.msrb.gmra.mxu1 %v607_v34 }
 0x174   : > { %v586_v58 = vld [vmem:[#allocation3] sm:$0xff] }
 0x175   : > { %v587_v35 = vld [vmem:[#allocation3 + $0x8] sm:$0xff] }
 0x176   : > { %v749_v59 = vld [vmem:[#allocation3 + $0x2] sm:$0xff]  ;;  %v750_v60 = vld [vmem:[#allocation3 + $0xa] sm:$0xff]  ;;  %v588_v61 = vpack.c.bf16 %v587_v35, %v586_v58 }
 0x177   : > { %v751_v36 = vpack.c.bf16 %v750_v60, %v749_v59 }
 0x178   : > { %743 = vmatmul.bf16.vlgmr.msra.gmra.mxu2 %v588_v61 }
 0x179   : > { %825 = vmatmul.bf16.vlgmr.msrb.gmra.mxu3 %v751_v36 }
 0x1ec   : > { %v682_v62 = vpop.f32.mrf.mxu1 }
 0x1f4   : > { %v684_v1 = vpop.f32.mrf.mxu1 }
 0x1fb   : > { %v744_v38 = vpop.f32.mrf.mxu2 }
 0x1fc   : > { %v826_v63 = vpop.f32.mrf.mxu3  ;;  %v745_v0 = vadd.f32 %v744_v38, %v682_v62 }
 0x1fe   : > { %v831_v2 = vadd.f32 %v826_v63, %v745_v0 }
 0x200   : > { %v840_v40 = vmul.f32 %v831_v2, %v831_v2 }
 0x203   : > { %v746_v39 = vpop.f32.mrf.mxu2 }
 0x204   : > { %v747_v3 = vadd.f32 %v746_v39, %v684_v1  ;;  %v828_v4 = vpop.f32.mrf.mxu3 }
 0x206   : > { %v832_v5 = vadd.f32 %v828_v4, %v747_v3 }
 0x208   : > { %v833_v6 = vadd.f32 %v832_v5, %v831_v2  ;;  %v841_v7 = vmul.f32 %v832_v5, %v832_v5 }
 0x20a   : > { %v834_v8 = vrot.slane %v833_v6, 4  ;;  %v842_v9 = vadd.f32 %v841_v7, %v840_v40 }
 0x20c   : > { %v835_v10 = vadd.f32 %v834_v8, %v833_v6  ;;  %v843_v11 = vrot.slane %v842_v9, 4 }
 0x20e   : > { %v844_v12 = vadd.f32 %v843_v11, %v842_v9  ;;  %v836_v13 = vrot.slane %v835_v10, 2 }
 0x210   : > { %v845_v14 = vrot.slane %v844_v12, 2  ;;  %v837_v15 = vadd.f32 %v836_v13, %v835_v10 }
 0x212   : > { %v838_v16 = vrot.slane %v837_v15, 1  ;;  %v846_v17 = vadd.f32 %v845_v14, %v844_v12 }
 0x214   : > { %v839_v18 = vadd.f32 %v838_v16, %v837_v15  ;;  %v847_v19 = vrot.slane %v846_v17, 1 }
 0x216   : > { %881 = vmatmul.f32.vlgmr.msrb.gmra.mxu0 %v839_v18  ;;  %v848_v20 = vadd.f32 %v847_v19, %v846_v17 }
 0x218   : > { %901 = vmatmul.f32.vlgmr.msra.gmra.mxu1 %v848_v20 }
 0x293   : > { %v882_v21 = vpop.f32.mrf.mxu0 }
 0x294   : > { %v905_v22 = vmul.f32 %v882_v21, %v882_v21  ;;  %v918_v24 = vperm.slane %v882_v21, 0 }
 0x295   : > { %v902_v23 = vpop.f32.mrf.mxu1 }
 0x296   : > { %v906_v37 = vsub.f32 %v902_v23, %v905_v22  ;;  %v919_v51 = vsub.f32 %v831_v2, %v918_v24  ;;  %v920_v52 = vsub.f32 %v832_v5, %v918_v24 }
 0x298   : > { %v907_v41 = vadd.f32 1e-05, %v906_v37 }
 0x29a   : > { %1252 = vrsqrt.f32 %v907_v41  ;;  %vm914_vm6 = vweird.f32 %v907_v41 }
 0x2a0   : > { %v1253_v42 = vpop.eup %1252 }
 0x2a1   : > { %v909_v43 = vmul.f32 %v1253_v42, %v907_v41  ;;  %vm915_vm5 = vweird.f32 %v1253_v42 }
 0x2a2   : > { %vm916_vm7 = vmor %vm914_vm6, %vm915_vm5 }
 0x2a3   : > { %v910_v44 = vmul.f32 %v1253_v42, %v909_v43 }
 0x2a5   : > { %v911_v45 = vmul.f32 0.5, %v910_v44 }
 0x2a7   : > { %v912_v46 = vsub.f32 1.5, %v911_v45 }
 0x2a9   : > { %v913_v48 = vmul.f32 %v1253_v42, %v912_v46 }
 0x2ab   : > { %v917_v50 = vsel %vm916_vm7, %v1253_v42, %v913_v48 }
 0x2ac   : > { %v921_v25 = vperm.slane %v917_v50, 0 }
 0x2ae   : > { %v922_v27 = vmul.f32 %v921_v25, %v919_v51  ;;  %v923_v28 = vmul.f32 %v921_v25, %v920_v52 }
 0x2b0   : > { %v927_v53 = vmul.f32 %v1248_v26, %v922_v27  ;;  %v928_v30 = vmul.f32 %v1248_v26, %v923_v28 }
 0x2b2   : > { %v932_v31 = vadd.f32 %v1249_v29, %v927_v53  ;;  %v933_v54 = vadd.f32 %v1249_v29, %v928_v30 }
 0x2b4   : > { %v934_v32 = vmax.f32 %v932_v31, 0.0  ;;  %v935_v33 = vmax.f32 %v933_v54, 0.0 }
 0x2b6   : > { %936 = vst [vmem:[%s305_s10] sm:$0xff] %v934_v32 }
 0x2b7   : > { %937 = vst [vmem:[%s305_s10 + $0x8] sm:$0xff] %v935_v33 }
 0x2b8 PF: > { %s18_s27 = sadd.s32 1, %s1260_s27  }
 0x2b9   : > { %p15_p4 = scmp.ge.s32.totalorder %s18_s27, 4  }
 0x2bb   :  { %17 = sbr.rel (!%p15_p4) target bundleno = 1 (0x1), region = 86 }

</bundles_post_ra>
